<compile_context>
chip_gen: v7x
topology: tpu7x:2x2x1
jax: 0.10.0
libtpu: 0.0.40
codegen_flags: <defaults>
</compile_context>

<pallas_src>
import jax
import jax.numpy as jnp
from jax.experimental import pallas as pl
from jax.experimental.pallas import tpu as pltpu


def _stencil_abs_sum(r0, r1, r2, row_mask=None):
    """Sum_c |(Kc (*) D)[r, c]| for output rows whose source rows (r-1, r, r+1) are the
    bands r0, r1, r2 (each (rows, W)).  Left/right zero padding is handled with explicit
    edge-column formulas built from static slices only (no rolls / lane concats).

    Kc = 0.5*(Sobel_x + Sobel_y) = [[-1,-1,0],[-1,0,1],[0,1,1]], hence
      O[c] = -(r0+r1)[c-1] + (r1+r2)[c+1] + (r2-r0)[c].

    `row_mask` (rows, 1) optionally zeroes output rows that lie below the image
    (only used by the partial last row tile when H % tile_h != 0).
    """
    w = r0.shape[-1]
    u = r0 + r1          # enters via column c-1, weight -1
    v = r1 + r2          # enters via column c+1, weight +1
    dr = r2 - r0         # enters at column c
    mid = v[:, 2:] - u[:, : w - 2] + dr[:, 1 : w - 1]     # columns 1 .. W-2
    c0 = v[:, 1:2] + dr[:, 0:1]                           # column 0   (left zero pad)
    cl = -u[:, w - 2 : w - 1] + dr[:, w - 1 : w]          # column W-1 (right zero pad)
    a_mid, a_c0, a_cl = jnp.abs(mid), jnp.abs(c0), jnp.abs(cl)
    if row_mask is not None:
        a_mid = jnp.where(row_mask, a_mid, 0.0)
        a_c0 = jnp.where(row_mask, a_c0, 0.0)
        a_cl = jnp.where(row_mask, a_cl, 0.0)
    return jnp.sum(a_mid) + jnp.sum(a_c0) + jnp.sum(a_cl)


def _make_sobel_kernel(h_total, tile_h, ragged):
    """Build the kernel closed over the static image height / tile height / ragged flag."""

    def kernel(p_ref, t_ref, o_ref, carry_ref):
        # p_ref, t_ref: (1, 3, tile_h, W) raw RGB blocks (any float dtype; upcast here).
        # o_ref:        (1, 8, 128) resident per-image accumulator (every element holds
        #               the same running sum -> lane-dense, unmasked stores).
        # carry_ref:    (2, W) VMEM scratch carrying the last two gray-diff rows of the
        #               previous row tile (the top halo of this tile).
        t_idx = pl.program_id(1)
        n_t = pl.num_programs(1)

        @pl.when(t_idx == 0)
        def _():
            o_ref[...] = jnp.zeros_like(o_ref)
            carry_ref[...] = jnp.zeros_like(carry_ref)   # == zero pad rows above row 0

        # Grayscale difference plane of this row tile (per-plane upcast -> bf16 callers
        # stream half the HBM bytes with no extra wrapper pass).
        d = (0.2989 * (p_ref[0, 0].astype(jnp.float32) - t_ref[0, 0].astype(jnp.float32))
             + 0.5870 * (p_ref[0, 1].astype(jnp.float32) - t_ref[0, 1].astype(jnp.float32))
             + 0.1140 * (p_ref[0, 2].astype(jnp.float32) - t_ref[0, 2].astype(jnp.float32)))
        th = d.shape[0]

        interior_mask = None
        if ragged:
            # Partial last block: source rows past the image bottom hold uninitialized
            # data.  Zero them so they behave exactly like the conv2d padding=1 border,
            # and mask interior output rows that would fall below the image.
            rows_left = h_total - t_idx * tile_h          # valid source rows in block
            src_row = jax.lax.broadcasted_iota(jnp.int32, (th, 1), 0)
            d = jnp.where(src_row < rows_left, d, 0.0)
            out_row = jax.lax.broadcasted_iota(jnp.int32, (th - 2, 1), 0)
            interior_mask = out_row < rows_left - 1       # keep image rows t*TH+1 .. H-1

        top0 = carry_ref[0:1, :]          # image row t*TH - 2  (zeros for t == 0)
        top1 = carry_ref[1:2, :]          # image row t*TH - 1  (zeros for t == 0)

        # (a) interior output rows t*TH+1 .. t*TH+TH-2: 3-row support inside this tile.
        acc = _stencil_abs_sum(d[0 : th - 2], d[1 : th - 1], d[2:th], interior_mask)
        # (b) output row t*TH: the row above it is carry[1] (zero pad when t == 0).
        acc += _stencil_abs_sum(top1, d[0:1], d[1:2])
        # (c) output row t*TH-1 (straddles the previous tile); does not exist for t == 0.
        acc += jnp.where(t_idx > 0, _stencil_abs_sum(top0, top1, d[0:1]), 0.0)
        if not ragged:
            # (d) bottom border row H-1: contributed only by the last row tile.
            # (When ragged, the zero-masked tail rows make (a)/(b) cover it already.)
            zero_row = jnp.zeros_like(top0)
            acc += jnp.where(
                t_idx == n_t - 1,
                _stencil_abs_sum(d[th - 2 : th - 1], d[th - 1 : th], zero_row),
                0.0)

        # Carry the last two diff rows for the next row tile of this image.
        carry_ref[...] = d[th - 2 : th, :]

        o_ref[...] = o_ref[...] + acc

    return kernel


def _pick_tile_h(h, w, itemsize, align):
    """Largest `align`-multiple row tile keeping a (3, tile_h, W) input block ~4 MiB
    (2 inputs x 2 pipeline buffers ~= 16 MiB of double-buffered input VMEM)."""
    budget = 4 << 20
    max_th = max(align, budget // (3 * w * itemsize))
    th = (max_th // align) * align
    if th >= h:
        return h        # single full-height tile (block dim == full extent, always legal)
    return th


def sobel_loss(y_pred, y_true, *, tile_h=None):
    """Pallas TPU implementation of SobelLoss.forward.

    Inputs: NCHW with C == 3.  Any float dtype (bf16 recommended for HBM-bound shapes;
    the kernel upcasts per channel plane in-kernel, no wrapper pass).
    """
    if y_pred.shape != y_true.shape:
        raise ValueError("y_pred / y_true shape mismatch")
    B, C, H, W = y_pred.shape
    if C != 3:
        raise ValueError("SobelLoss expects RGB inputs (C == 3)")
    if H < 3 or W < 3:
        raise ValueError("spatial dims must be >= 3 for a 3x3 Sobel stencil")

    itemsize = max(jnp.dtype(y_pred.dtype).itemsize, jnp.dtype(y_true.dtype).itemsize)
    align = max(8, 32 // itemsize)        # 8 for f32, 16 for bf16/f16, 32 for int8/fp8

    if tile_h is None:
        tile_h = _pick_tile_h(H, W, itemsize, align)
    tile_h = min(int(tile_h), H)
    if tile_h != H and tile_h % align != 0:
        raise ValueError(f"tile_h={tile_h} must be a multiple of {align} or equal H={H}")

    n_tiles = (H + tile_h - 1) // tile_h
    ragged = (H % tile_h) != 0

    kernel = _make_sobel_kernel(H, tile_h, ragged)

    partials = pl.pallas_call(
        kernel,
        out_shape=jax.ShapeDtypeStruct((B, 8, 128), jnp.float32),
        grid_spec=pltpu.PrefetchScalarGridSpec(
            num_scalar_prefetch=0,
            grid=(B, n_tiles),
            in_specs=[
                pl.BlockSpec((1, 3, tile_h, W), lambda b, t: (b, 0, t, 0)),
                pl.BlockSpec((1, 3, tile_h, W), lambda b, t: (b, 0, t, 0)),
            ],
            out_specs=pl.BlockSpec((1, 8, 128), lambda b, t: (b, 0, 0)),
            scratch_shapes=[pltpu.VMEM((2, W), jnp.float32)],
        ),
        compiler_params=pltpu.CompilerParams(
            dimension_semantics=("parallel", "arbitrary"),
            vmem_limit_bytes=48 * 1024 * 1024,   # headroom for f32 temps; < v7x 64 MiB
        ),
    )(y_pred, y_true)

    # Tiny final reduction in plain JAX (every lane of a block holds the same per-image
    # sum); torch.mean over (B, 1, H, W) => divide by B*H*W.
    return jnp.sum(partials[:, 0, 0]) / (B * H * W)


def _sobel_loss_ref(y_pred, y_true):
    """Pure-JAX reference mirroring the PyTorch forward."""
    sx = jnp.array([[-1.0, 0.0, 1.0], [-2.0, 0.0, 2.0], [-1.0, 0.0, 1.0]],
                   jnp.float32)[None, None]
    sy = jnp.array([[-1.0, -2.0, -1.0], [0.0, 0.0, 0.0], [1.0, 2.0, 1.0]],
                   jnp.float32)[None, None]

    def gray(x):
        x = x.astype(jnp.float32)
        return (x[:, 0] * 0.2989 + x[:, 1] * 0.587 + x[:, 2] * 0.114)[:, None]

    def conv(g, k):
        return jax.lax.conv_general_dilated(g, k, (1, 1), ((1, 1), (1, 1)))

    pg, tg = gray(y_pred), gray(y_true)
    sobel_p = conv(pg, sx) * 0.5 + conv(pg, sy) * 0.5
    sobel_t = conv(tg, sx) * 0.5 + conv(tg, sy) * 0.5
    return jnp.mean(jnp.abs(sobel_p - sobel_t))


if __name__ == "__main__":
    key = jax.random.PRNGKey(0)
    k1, k2, k3, k4, k5, k6, k7, k8 = jax.random.split(key, 8)

    # Case 1: small spec-sized shape (single full-height tile per image).
    B, C, H, W = 2, 3, 16, 16
    yp = jax.random.normal(k1, (B, C, H, W), dtype=jnp.float32)
    yt = jax.random.normal(k2, (B, C, H, W), dtype=jnp.float32)
    got = jax.block_until_ready(sobel_loss(yp, yt))
    want = jax.block_until_ready(_sobel_loss_ref(yp, yt))
    if not jnp.allclose(got, want, rtol=1e-4, atol=1e-5):
        raise AssertionError(f"case1 mismatch: pallas={got}, ref={want}")

    # Case 2: lane-dense width + multiple row tiles (exercises the halo carry).
    B2, H2, W2 = 2, 32, 128
    yp2 = jax.random.normal(k3, (B2, C, H2, W2), dtype=jnp.float32)
    yt2 = jax.random.normal(k4, (B2, C, H2, W2), dtype=jnp.float32)
    got2 = jax.block_until_ready(sobel_loss(yp2, yt2, tile_h=8))
    want2 = jax.block_until_ready(_sobel_loss_ref(yp2, yt2))
    if not jnp.allclose(got2, want2, rtol=1e-4, atol=1e-5):
        raise AssertionError(f"case2 mismatch: pallas={got2}, ref={want2}")

    # Case 3: ragged H (H % tile_h != 0): partial last block + in-kernel row masking.
    B3, H3, W3 = 1, 20, 16
    yp3 = jax.random.normal(k5, (B3, C, H3, W3), dtype=jnp.float32)
    yt3 = jax.random.normal(k6, (B3, C, H3, W3), dtype=jnp.float32)
    got3 = jax.block_until_ready(sobel_loss(yp3, yt3, tile_h=8))
    want3 = jax.block_until_ready(_sobel_loss_ref(yp3, yt3))
    if not jnp.allclose(got3, want3, rtol=1e-4, atol=1e-5):
        raise AssertionError(f"case3 mismatch: pallas={got3}, ref={want3}")

    # Case 4: bf16 inputs (half the HBM bytes) with the 16-row packed-dtype alignment.
    B4, H4, W4 = 2, 32, 128
    yp4 = jax.random.normal(k7, (B4, C, H4, W4), dtype=jnp.float32).astype(jnp.bfloat16)
    yt4 = jax.random.normal(k8, (B4, C, H4, W4), dtype=jnp.float32).astype(jnp.bfloat16)
    got4 = jax.block_until_ready(sobel_loss(yp4, yt4, tile_h=16))
    want4 = jax.block_until_ready(_sobel_loss_ref(yp4, yt4))
    if not jnp.allclose(got4, want4, rtol=1e-3, atol=1e-4):
        raise AssertionError(f"case4 mismatch: pallas={got4}, ref={want4}")

    print("KERNEL_OK")
</pallas_src>

<mosaic_0001>
module attributes {stable_mosaic.version = 11 : i64} {
  func.func @kernel(%arg0: i32, %arg1: i32, %arg2: memref<1x3x16x16xf32, #tpu.memory_space<vmem>>, %arg3: memref<1x3x16x16xf32, #tpu.memory_space<vmem>>, %arg4: memref<1x8x128xf32, #tpu.memory_space<vmem>>, %arg5: memref<2x16xf32, #tpu.memory_space<vmem>>) attributes {dimension_semantics = [#tpu.dimension_semantics<parallel>, #tpu.dimension_semantics<arbitrary>], iteration_bounds = array<i64: 2, 1>, scalar_prefetch = 0 : i64, scratch_operands = 1 : i64, tpu.core_type = #tpu.core_type<tc>, window_params = [{transform_indices = @transform_0, window_bounds = array<i64: 1, 3, 16, 16>}, {transform_indices = @transform_1, window_bounds = array<i64: 1, 3, 16, 16>}, {transform_indices = @transform_2, window_bounds = array<i64: 1, 8, 128>}]} {
    %c0_i32 = arith.constant 0 : i32
    %0 = arith.cmpi eq, %arg1, %c0_i32 : i32
    %1 = arith.extui %0 : i1 to i32
    %c0_i32_0 = arith.constant 0 : i32
    %2 = arith.cmpi ne, %1, %c0_i32_0 : i32
    scf.if %2 {
      %cst_57 = arith.constant 0.000000e+00 : f32
      %182 = vector.broadcast %cst_57 : f32 to vector<1x8x128xf32>
      %c0_58 = arith.constant 0 : index
      %c0_59 = arith.constant 0 : index
      %c0_60 = arith.constant 0 : index
      %183 = vector.load %arg4[%c0_58, %c0_59, %c0_60] : memref<1x8x128xf32, #tpu.memory_space<vmem>>, vector<1x8x128xf32>
      tpu.vector_store %arg4[%c0_58, %c0_59, %c0_60], %182 {strides = array<i32>} : memref<1x8x128xf32, #tpu.memory_space<vmem>>, vector<1x8x128xf32>,
      %cst_61 = arith.constant 0.000000e+00 : f32
      %184 = vector.broadcast %cst_61 : f32 to vector<2x16xf32>
      %c0_62 = arith.constant 0 : index
      %c0_63 = arith.constant 0 : index
      %185 = vector.load %arg5[%c0_62, %c0_63] : memref<2x16xf32, #tpu.memory_space<vmem>>, vector<2x16xf32>
      tpu.vector_store %arg5[%c0_62, %c0_63], %184 {strides = array<i32>} : memref<2x16xf32, #tpu.memory_space<vmem>>, vector<2x16xf32>,
    } else {
    }
    %c0 = arith.constant 0 : index
    %c0_1 = arith.constant 0 : index
    %c0_2 = arith.constant 0 : index
    %c0_3 = arith.constant 0 : index
    %3 = vector.load %arg2[%c0, %c0_1, %c0_2, %c0_3] : memref<1x3x16x16xf32, #tpu.memory_space<vmem>>, vector<1x1x16x16xf32>
    %4 = vector.shape_cast %3 : vector<1x1x16x16xf32> to vector<16x16xf32>
    %c0_4 = arith.constant 0 : index
    %c0_5 = arith.constant 0 : index
    %c0_6 = arith.constant 0 : index
    %c0_7 = arith.constant 0 : index
    %5 = vector.load %arg3[%c0_4, %c0_5, %c0_6, %c0_7] : memref<1x3x16x16xf32, #tpu.memory_space<vmem>>, vector<1x1x16x16xf32>
    %6 = vector.shape_cast %5 : vector<1x1x16x16xf32> to vector<16x16xf32>
    %7 = arith.subf %4, %6 : vector<16x16xf32>
    %cst = arith.constant 2.989000e-01 : f32
    %8 = vector.broadcast %cst : f32 to vector<16x16xf32>
    %9 = arith.mulf %8, %7 : vector<16x16xf32>
    %c0_8 = arith.constant 0 : index
    %c1 = arith.constant 1 : index
    %c0_9 = arith.constant 0 : index
    %c0_10 = arith.constant 0 : index
    %10 = vector.load %arg2[%c0_8, %c1, %c0_9, %c0_10] : memref<1x3x16x16xf32, #tpu.memory_space<vmem>>, vector<1x1x16x16xf32>
    %11 = vector.shape_cast %10 : vector<1x1x16x16xf32> to vector<16x16xf32>
    %c0_11 = arith.constant 0 : index
    %c1_12 = arith.constant 1 : index
    %c0_13 = arith.constant 0 : index
    %c0_14 = arith.constant 0 : index
    %12 = vector.load %arg3[%c0_11, %c1_12, %c0_13, %c0_14] : memref<1x3x16x16xf32, #tpu.memory_space<vmem>>, vector<1x1x16x16xf32>
    %13 = vector.shape_cast %12 : vector<1x1x16x16xf32> to vector<16x16xf32>
    %14 = arith.subf %11, %13 : vector<16x16xf32>
    %cst_15 = arith.constant 5.870000e-01 : f32
    %15 = vector.broadcast %cst_15 : f32 to vector<16x16xf32>
    %16 = arith.mulf %15, %14 : vector<16x16xf32>
    %17 = arith.addf %9, %16 : vector<16x16xf32>
    %c0_16 = arith.constant 0 : index
    %c2 = arith.constant 2 : index
    %c0_17 = arith.constant 0 : index
    %c0_18 = arith.constant 0 : index
    %18 = vector.load %arg2[%c0_16, %c2, %c0_17, %c0_18] : memref<1x3x16x16xf32, #tpu.memory_space<vmem>>, vector<1x1x16x16xf32>
    %19 = vector.shape_cast %18 : vector<1x1x16x16xf32> to vector<16x16xf32>
    %c0_19 = arith.constant 0 : index
    %c2_20 = arith.constant 2 : index
    %c0_21 = arith.constant 0 : index
    %c0_22 = arith.constant 0 : index
    %20 = vector.load %arg3[%c0_19, %c2_20, %c0_21, %c0_22] : memref<1x3x16x16xf32, #tpu.memory_space<vmem>>, vector<1x1x16x16xf32>
    %21 = vector.shape_cast %20 : vector<1x1x16x16xf32> to vector<16x16xf32>
    %22 = arith.subf %19, %21 : vector<16x16xf32>
    %cst_23 = arith.constant 1.140000e-01 : f32
    %23 = vector.broadcast %cst_23 : f32 to vector<16x16xf32>
    %24 = arith.mulf %23, %22 : vector<16x16xf32>
    %25 = arith.addf %17, %24 : vector<16x16xf32>
    %c0_24 = arith.constant 0 : index
    %c0_25 = arith.constant 0 : index
    %26 = vector.load %arg5[%c0_24, %c0_25] : memref<2x16xf32, #tpu.memory_space<vmem>>, vector<1x16xf32>
    %c1_26 = arith.constant 1 : index
    %c0_27 = arith.constant 0 : index
    %27 = vector.load %arg5[%c1_26, %c0_27] : memref<2x16xf32, #tpu.memory_space<vmem>>, vector<1x16xf32>
    %28 = vector.extract_strided_slice %25 {offsets = [0, 0], sizes = [14, 16], strides = [1, 1]} : vector<16x16xf32> to vector<14x16xf32>
    %29 = vector.extract_strided_slice %25 {offsets = [1, 0], sizes = [14, 16], strides = [1, 1]} : vector<16x16xf32> to vector<14x16xf32>
    %30 = vector.extract_strided_slice %25 {offsets = [2, 0], sizes = [14, 16], strides = [1, 1]} : vector<16x16xf32> to vector<14x16xf32>
    %31 = arith.addf %28, %29 : vector<14x16xf32>
    %32 = arith.addf %29, %30 : vector<14x16xf32>
    %33 = arith.subf %30, %28 : vector<14x16xf32>
    %34 = vector.extract_strided_slice %32 {offsets = [0, 2], sizes = [14, 14], strides = [1, 1]} : vector<14x16xf32> to vector<14x14xf32>
    %35 = vector.extract_strided_slice %31 {offsets = [0, 0], sizes = [14, 14], strides = [1, 1]} : vector<14x16xf32> to vector<14x14xf32>
    %36 = arith.subf %34, %35 : vector<14x14xf32>
    %37 = vector.extract_strided_slice %33 {offsets = [0, 1], sizes = [14, 14], strides = [1, 1]} : vector<14x16xf32> to vector<14x14xf32>
    %38 = arith.addf %36, %37 : vector<14x14xf32>
    %39 = vector.extract_strided_slice %32 {offsets = [0, 1], sizes = [14, 1], strides = [1, 1]} : vector<14x16xf32> to vector<14x1xf32>
    %40 = vector.extract_strided_slice %33 {offsets = [0, 0], sizes = [14, 1], strides = [1, 1]} : vector<14x16xf32> to vector<14x1xf32>
    %41 = arith.addf %39, %40 : vector<14x1xf32>
    %42 = vector.extract_strided_slice %31 {offsets = [0, 14], sizes = [14, 1], strides = [1, 1]} : vector<14x16xf32> to vector<14x1xf32>
    %cst_28 = arith.constant 0.000000e+00 : f32
    %43 = vector.broadcast %cst_28 : f32 to vector<14x1xf32>
    %44 = arith.subf %43, %42 : vector<14x1xf32>
    %45 = vector.extract_strided_slice %33 {offsets = [0, 15], sizes = [14, 1], strides = [1, 1]} : vector<14x16xf32> to vector<14x1xf32>
    %46 = arith.addf %44, %45 : vector<14x1xf32>
    %47 = math.absf %38 : vector<14x14xf32>
    %48 = math.absf %41 : vector<14x1xf32>
    %49 = math.absf %46 : vector<14x1xf32>
    %50 = vector.shape_cast %47 : vector<14x14xf32> to vector<1x14x14xf32>
    %cst_29 = arith.constant dense<0.000000e+00> : vector<1xf32>
    %51 = vector.multi_reduction <add>, %50, %cst_29 [1, 2] : vector<1x14x14xf32> to vector<1xf32>
    %52 = vector.shape_cast %51 : vector<1xf32> to vector<1x1x1xf32>
    %53 = vector.extract %52[0, 0, 0] : f32 from vector<1x1x1xf32>
    %54 = vector.shape_cast %48 : vector<14x1xf32> to vector<1x14x1xf32>
    %cst_30 = arith.constant dense<0.000000e+00> : vector<1xf32>
    %55 = vector.multi_reduction <add>, %54, %cst_30 [1, 2] : vector<1x14x1xf32> to vector<1xf32>
    %56 = vector.shape_cast %55 : vector<1xf32> to vector<1x1x1xf32>
    %57 = vector.extract %56[0, 0, 0] : f32 from vector<1x1x1xf32>
    %58 = arith.addf %53, %57 : f32
    %59 = vector.shape_cast %49 : vector<14x1xf32> to vector<1x14x1xf32>
    %cst_31 = arith.constant dense<0.000000e+00> : vector<1xf32>
    %60 = vector.multi_reduction <add>, %59, %cst_31 [1, 2] : vector<1x14x1xf32> to vector<1xf32>
    %61 = vector.shape_cast %60 : vector<1xf32> to vector<1x1x1xf32>
    %62 = vector.extract %61[0, 0, 0] : f32 from vector<1x1x1xf32>
    %63 = arith.addf %58, %62 : f32
    %64 = vector.extract_strided_slice %25 {offsets = [0, 0], sizes = [1, 16], strides = [1, 1]} : vector<16x16xf32> to vector<1x16xf32>
    %65 = vector.extract_strided_slice %25 {offsets = [1, 0], sizes = [1, 16], strides = [1, 1]} : vector<16x16xf32> to vector<1x16xf32>
    %66 = arith.addf %27, %64 : vector<1x16xf32>
    %67 = arith.addf %64, %65 : vector<1x16xf32>
    %68 = arith.subf %65, %27 : vector<1x16xf32>
    %69 = vector.extract_strided_slice %67 {offsets = [0, 2], sizes = [1, 14], strides = [1, 1]} : vector<1x16xf32> to vector<1x14xf32>
    %70 = vector.extract_strided_slice %66 {offsets = [0, 0], sizes = [1, 14], strides = [1, 1]} : vector<1x16xf32> to vector<1x14xf32>
    %71 = arith.subf %69, %70 : vector<1x14xf32>
    %72 = vector.extract_strided_slice %68 {offsets = [0, 1], sizes = [1, 14], strides = [1, 1]} : vector<1x16xf32> to vector<1x14xf32>
    %73 = arith.addf %71, %72 : vector<1x14xf32>
    %74 = vector.extract_strided_slice %67 {offsets = [0, 1], sizes = [1, 1], strides = [1, 1]} : vector<1x16xf32> to vector<1x1xf32>
    %75 = vector.extract_strided_slice %68 {offsets = [0, 0], sizes = [1, 1], strides = [1, 1]} : vector<1x16xf32> to vector<1x1xf32>
    %76 = arith.addf %74, %75 : vector<1x1xf32>
    %77 = vector.extract_strided_slice %66 {offsets = [0, 14], sizes = [1, 1], strides = [1, 1]} : vector<1x16xf32> to vector<1x1xf32>
    %cst_32 = arith.constant 0.000000e+00 : f32
    %78 = vector.broadcast %cst_32 : f32 to vector<1x1xf32>
    %79 = arith.subf %78, %77 : vector<1x1xf32>
    %80 = vector.extract_strided_slice %68 {offsets = [0, 15], sizes = [1, 1], strides = [1, 1]} : vector<1x16xf32> to vector<1x1xf32>
    %81 = arith.addf %79, %80 : vector<1x1xf32>
    %82 = math.absf %73 : vector<1x14xf32>
    %83 = math.absf %76 : vector<1x1xf32>
    %84 = math.absf %81 : vector<1x1xf32>
    %85 = vector.shape_cast %82 : vector<1x14xf32> to vector<1x1x14xf32>
    %cst_33 = arith.constant dense<0.000000e+00> : vector<1xf32>
    %86 = vector.multi_reduction <add>, %85, %cst_33 [1, 2] : vector<1x1x14xf32> to vector<1xf32>
    %87 = vector.shape_cast %86 : vector<1xf32> to vector<1x1x1xf32>
    %88 = vector.extract %87[0, 0, 0] : f32 from vector<1x1x1xf32>
    %89 = vector.shape_cast %83 : vector<1x1xf32> to vector<1x1x1xf32>
    %cst_34 = arith.constant dense<0.000000e+00> : vector<1xf32>
    %90 = vector.multi_reduction <add>, %89, %cst_34 [1, 2] : vector<1x1x1xf32> to vector<1xf32>
    %91 = vector.shape_cast %90 : vector<1xf32> to vector<1x1x1xf32>
    %92 = vector.extract %91[0, 0, 0] : f32 from vector<1x1x1xf32>
    %93 = arith.addf %88, %92 : f32
    %94 = vector.shape_cast %84 : vector<1x1xf32> to vector<1x1x1xf32>
    %cst_35 = arith.constant dense<0.000000e+00> : vector<1xf32>
    %95 = vector.multi_reduction <add>, %94, %cst_35 [1, 2] : vector<1x1x1xf32> to vector<1xf32>
    %96 = vector.shape_cast %95 : vector<1xf32> to vector<1x1x1xf32>
    %97 = vector.extract %96[0, 0, 0] : f32 from vector<1x1x1xf32>
    %98 = arith.addf %93, %97 : f32
    %99 = arith.addf %63, %98 : f32
    %c0_i32_36 = arith.constant 0 : i32
    %100 = arith.cmpi sgt, %arg1, %c0_i32_36 : i32
    %101 = vector.extract_strided_slice %25 {offsets = [0, 0], sizes = [1, 16], strides = [1, 1]} : vector<16x16xf32> to vector<1x16xf32>
    %102 = arith.addf %26, %27 : vector<1x16xf32>
    %103 = arith.addf %27, %101 : vector<1x16xf32>
    %104 = arith.subf %101, %26 : vector<1x16xf32>
    %105 = vector.extract_strided_slice %103 {offsets = [0, 2], sizes = [1, 14], strides = [1, 1]} : vector<1x16xf32> to vector<1x14xf32>
    %106 = vector.extract_strided_slice %102 {offsets = [0, 0], sizes = [1, 14], strides = [1, 1]} : vector<1x16xf32> to vector<1x14xf32>
    %107 = arith.subf %105, %106 : vector<1x14xf32>
    %108 = vector.extract_strided_slice %104 {offsets = [0, 1], sizes = [1, 14], strides = [1, 1]} : vector<1x16xf32> to vector<1x14xf32>
    %109 = arith.addf %107, %108 : vector<1x14xf32>
    %110 = vector.extract_strided_slice %103 {offsets = [0, 1], sizes = [1, 1], strides = [1, 1]} : vector<1x16xf32> to vector<1x1xf32>
    %111 = vector.extract_strided_slice %104 {offsets = [0, 0], sizes = [1, 1], strides = [1, 1]} : vector<1x16xf32> to vector<1x1xf32>
    %112 = arith.addf %110, %111 : vector<1x1xf32>
    %113 = vector.extract_strided_slice %102 {offsets = [0, 14], sizes = [1, 1], strides = [1, 1]} : vector<1x16xf32> to vector<1x1xf32>
    %cst_37 = arith.constant 0.000000e+00 : f32
    %114 = vector.broadcast %cst_37 : f32 to vector<1x1xf32>
    %115 = arith.subf %114, %113 : vector<1x1xf32>
    %116 = vector.extract_strided_slice %104 {offsets = [0, 15], sizes = [1, 1], strides = [1, 1]} : vector<1x16xf32> to vector<1x1xf32>
    %117 = arith.addf %115, %116 : vector<1x1xf32>
    %118 = math.absf %109 : vector<1x14xf32>
    %119 = math.absf %112 : vector<1x1xf32>
    %120 = math.absf %117 : vector<1x1xf32>
    %121 = vector.shape_cast %118 : vector<1x14xf32> to vector<1x1x14xf32>
    %cst_38 = arith.constant dense<0.000000e+00> : vector<1xf32>
    %122 = vector.multi_reduction <add>, %121, %cst_38 [1, 2] : vector<1x1x14xf32> to vector<1xf32>
    %123 = vector.shape_cast %122 : vector<1xf32> to vector<1x1x1xf32>
    %124 = vector.extract %123[0, 0, 0] : f32 from vector<1x1x1xf32>
    %125 = vector.shape_cast %119 : vector<1x1xf32> to vector<1x1x1xf32>
    %cst_39 = arith.constant dense<0.000000e+00> : vector<1xf32>
    %126 = vector.multi_reduction <add>, %125, %cst_39 [1, 2] : vector<1x1x1xf32> to vector<1xf32>
    %127 = vector.shape_cast %126 : vector<1xf32> to vector<1x1x1xf32>
    %128 = vector.extract %127[0, 0, 0] : f32 from vector<1x1x1xf32>
    %129 = arith.addf %124, %128 : f32
    %130 = vector.shape_cast %120 : vector<1x1xf32> to vector<1x1x1xf32>
    %cst_40 = arith.constant dense<0.000000e+00> : vector<1xf32>
    %131 = vector.multi_reduction <add>, %130, %cst_40 [1, 2] : vector<1x1x1xf32> to vector<1xf32>
    %132 = vector.shape_cast %131 : vector<1xf32> to vector<1x1x1xf32>
    %133 = vector.extract %132[0, 0, 0] : f32 from vector<1x1x1xf32>
    %134 = arith.addf %129, %133 : f32
    %cst_41 = arith.constant 0.000000e+00 : f32
    %135 = arith.select %100, %134, %cst_41 : f32
    %136 = arith.addf %99, %135 : f32
    %cst_42 = arith.constant 0.000000e+00 : f32
    %137 = vector.broadcast %cst_42 : f32 to vector<1x16xf32>
    %c0_i32_43 = arith.constant 0 : i32
    %138 = arith.cmpi eq, %arg1, %c0_i32_43 : i32
    %139 = vector.extract_strided_slice %25 {offsets = [14, 0], sizes = [1, 16], strides = [1, 1]} : vector<16x16xf32> to vector<1x16xf32>
    %140 = vector.extract_strided_slice %25 {offsets = [15, 0], sizes = [1, 16], strides = [1, 1]} : vector<16x16xf32> to vector<1x16xf32>
    %141 = arith.addf %139, %140 : vector<1x16xf32>
    %142 = arith.addf %140, %137 : vector<1x16xf32>
    %143 = arith.subf %137, %139 : vector<1x16xf32>
    %144 = vector.extract_strided_slice %142 {offsets = [0, 2], sizes = [1, 14], strides = [1, 1]} : vector<1x16xf32> to vector<1x14xf32>
    %145 = vector.extract_strided_slice %141 {offsets = [0, 0], sizes = [1, 14], strides = [1, 1]} : vector<1x16xf32> to vector<1x14xf32>
    %146 = arith.subf %144, %145 : vector<1x14xf32>
    %147 = vector.extract_strided_slice %143 {offsets = [0, 1], sizes = [1, 14], strides = [1, 1]} : vector<1x16xf32> to vector<1x14xf32>
    %148 = arith.addf %146, %147 : vector<1x14xf32>
    %149 = vector.extract_strided_slice %142 {offsets = [0, 1], sizes = [1, 1], strides = [1, 1]} : vector<1x16xf32> to vector<1x1xf32>
    %150 = vector.extract_strided_slice %143 {offsets = [0, 0], sizes = [1, 1], strides = [1, 1]} : vector<1x16xf32> to vector<1x1xf32>
    %151 = arith.addf %149, %150 : vector<1x1xf32>
    %152 = vector.extract_strided_slice %141 {offsets = [0, 14], sizes = [1, 1], strides = [1, 1]} : vector<1x16xf32> to vector<1x1xf32>
    %cst_44 = arith.constant 0.000000e+00 : f32
    %153 = vector.broadcast %cst_44 : f32 to vector<1x1xf32>
    %154 = arith.subf %153, %152 : vector<1x1xf32>
    %155 = vector.extract_strided_slice %143 {offsets = [0, 15], sizes = [1, 1], strides = [1, 1]} : vector<1x16xf32> to vector<1x1xf32>
    %156 = arith.addf %154, %155 : vector<1x1xf32>
    %157 = math.absf %148 : vector<1x14xf32>
    %158 = math.absf %151 : vector<1x1xf32>
    %159 = math.absf %156 : vector<1x1xf32>
    %160 = vector.shape_cast %157 : vector<1x14xf32> to vector<1x1x14xf32>
    %cst_45 = arith.constant dense<0.000000e+00> : vector<1xf32>
    %161 = vector.multi_reduction <add>, %160, %cst_45 [1, 2] : vector<1x1x14xf32> to vector<1xf32>
    %162 = vector.shape_cast %161 : vector<1xf32> to vector<1x1x1xf32>
    %163 = vector.extract %162[0, 0, 0] : f32 from vector<1x1x1xf32>
    %164 = vector.shape_cast %158 : vector<1x1xf32> to vector<1x1x1xf32>
    %cst_46 = arith.constant dense<0.000000e+00> : vector<1xf32>
    %165 = vector.multi_reduction <add>, %164, %cst_46 [1, 2] : vector<1x1x1xf32> to vector<1xf32>
    %166 = vector.shape_cast %165 : vector<1xf32> to vector<1x1x1xf32>
    %167 = vector.extract %166[0, 0, 0] : f32 from vector<1x1x1xf32>
    %168 = arith.addf %163, %167 : f32
    %169 = vector.shape_cast %159 : vector<1x1xf32> to vector<1x1x1xf32>
    %cst_47 = arith.constant dense<0.000000e+00> : vector<1xf32>
    %170 = vector.multi_reduction <add>, %169, %cst_47 [1, 2] : vector<1x1x1xf32> to vector<1xf32>
    %171 = vector.shape_cast %170 : vector<1xf32> to vector<1x1x1xf32>
    %172 = vector.extract %171[0, 0, 0] : f32 from vector<1x1x1xf32>
    %173 = arith.addf %168, %172 : f32
    %cst_48 = arith.constant 0.000000e+00 : f32
    %174 = arith.select %138, %173, %cst_48 : f32
    %175 = arith.addf %136, %174 : f32
    %176 = vector.extract_strided_slice %25 {offsets = [14, 0], sizes = [2, 16], strides = [1, 1]} : vector<16x16xf32> to vector<2x16xf32>
    %c0_49 = arith.constant 0 : index
    %c0_50 = arith.constant 0 : index
    %177 = vector.load %arg5[%c0_49, %c0_50] : memref<2x16xf32, #tpu.memory_space<vmem>>, vector<2x16xf32>
    tpu.vector_store %arg5[%c0_49, %c0_50], %176 {strides = array<i32>} : memref<2x16xf32, #tpu.memory_space<vmem>>, vector<2x16xf32>,
    %c0_51 = arith.constant 0 : index
    %c0_52 = arith.constant 0 : index
    %c0_53 = arith.constant 0 : index
    %178 = vector.load %arg4[%c0_51, %c0_52, %c0_53] : memref<1x8x128xf32, #tpu.memory_space<vmem>>, vector<1x8x128xf32>
    %179 = vector.broadcast %175 : f32 to vector<1x8x128xf32>
    %180 = arith.addf %178, %179 : vector<1x8x128xf32>
    %c0_54 = arith.constant 0 : index
    %c0_55 = arith.constant 0 : index
    %c0_56 = arith.constant 0 : index
    %181 = vector.load %arg4[%c0_54, %c0_55, %c0_56] : memref<1x8x128xf32, #tpu.memory_space<vmem>>, vector<1x8x128xf32>
    tpu.vector_store %arg4[%c0_54, %c0_55, %c0_56], %180 {strides = array<i32>} : memref<1x8x128xf32, #tpu.memory_space<vmem>>, vector<1x8x128xf32>,
    return
  }
  func.func @transform_0(%arg0: i32, %arg1: i32) -> (i32, i32, i32, i32) {
    %c0_i32 = arith.constant 0 : i32
    %c0_i32_0 = arith.constant 0 : i32
    %c0_i32_1 = arith.constant 0 : i32
    return %arg0, %c0_i32, %arg1, %c0_i32_0 : i32, i32, i32, i32
  }
  func.func @transform_1(%arg0: i32, %arg1: i32) -> (i32, i32, i32, i32) {
    %c0_i32 = arith.constant 0 : i32
    %c0_i32_0 = arith.constant 0 : i32
    %c0_i32_1 = arith.constant 0 : i32
    return %arg0, %c0_i32, %arg1, %c0_i32_0 : i32, i32, i32, i32
  }
  func.func @transform_2(%arg0: i32, %arg1: i32) -> (i32, i32, i32) {
    %c0_i32 = arith.constant 0 : i32
    %c0_i32_0 = arith.constant 0 : i32
    %c0_i32_1 = arith.constant 0 : i32
    return %arg0, %c0_i32, %c0_i32_0 : i32, i32, i32
  }
}

</mosaic_0001>

<bundles_post_ra>
// kernel: tpu_custom_call.1
= control target key start
LH: loop header
LB: loop body
LE: loop exit
PB: predicated region body
PF: predicated region fallthrough
CT: control target
= control target key end

     0   :  { %s1274_s0 = inlined_call_operand.hbm [shape: f32[2,3,16,16], index: 0, kind: input, shape index: {}]   ;;  %s1275_s1 = inlined_call_operand.hbm [shape: f32[2,3,16,16], index: 1, kind: input, shape index: {}]   ;;  %s1276_s2 = inlined_call_operand.hbm [shape: f32[2,8,128], index: 2, kind: output, shape index: {}]  }
   0x1   :  { %1280 = sst [smem:[#allocation13_spill]] %s1274_s0 }
   0x2   :  { %1281 = sst [smem:[#allocation14_spill]] %s1275_s1 }
   0x3   :  { %7 = vsyncpa [#allocation4], 0 }
   0x4   :  { %9 = vsyncpa [#allocation4 + $0x1], 0 }
   0x5   :  { %10 = vsyncpa [#allocation7], 0 }
   0x6   :  { %12 = vsyncpa [#allocation7 + $0x1], 0 }
   0x7   :  { %13 = vsyncpa [#allocation5], 0 }
   0x8   :  { %15 = vsyncpa [#allocation5 + $0x1], 0  ;;  %s985_s9 = smov 0   ;;  %s987_s10 = smov 0  }
   0x9   :  { %s989_s11 = smov 0   ;;  %s991_s12 = smov 0  }
   0xa   :  { %s993_s13 = smov 0   ;;  %s995_s14 = smov 0  }
   0xb LB: > { %s693_s15 = sadd.s32 4294967295, %s957_s14   ;;  %s694_s16 = sadd.s32 4294967294, %s957_s14   ;;  %s957_s14 = sphi %s995_s14, %s21_s14   ;;  %s953_s13 = sphi %s993_s13, %s1301_s13   ;;  %s949_s12 = sphi %s991_s12, %s1300_s12   ;;  %s945_s11 = sphi %s989_s11, %s1299_s11   ;;  %s941_s10 = sphi %s987_s10, %s1298_s10   ;;  %s937_s9 = sphi %s985_s9, %s1297_s9  }
   0xc   : > { %s33_s17 = sadd.s32 1, %s953_s13  ;;  %s42_s18 = sadd.s32 1, %s945_s11 }
   0xd   : > { %p35_p0 = scmp.ge.s32.totalorder %s33_s17, 2  ;;  %p49_p1 = scmp.ne.s32.totalorder %s945_s11, %s941_s10 }
   0xe   : > { %p50_p2 = scmp.eq.s32.totalorder %s957_s14, 0  ;;  %p55_p3 = scmp.ne.s32.totalorder %s941_s10, %s937_s9 }
   0xf   : > { %s1303_s17 = smov (%p35_p0, %s33_s17), 0  ;;  %p56_p5 = scmp.eq.s32.totalorder %s693_s15, 0 }
  0x10   : > { %1282 = sst [smem:[#allocation12_spill]] %s1303_s17  ;;  %p1026_p4 = por %p50_p2, %p49_p1 }
  0x11   : > { %s37_s20 = ssub.s32 %s953_s13, %s1303_s17  ;;  %p107_p6 = scmp.eq.s32.totalorder %s693_s15, 1 }
  0x12   : > { %p40_p7 = scmp.eq.s32.totalorder %s37_s20, 0  ;;  %p1032_p8 = por %p56_p5, %p55_p3 }
  0x13   : > { %p1036_p9 = por %p107_p6, %p49_p1  ;;  %p113_p10 = scmp.eq.s32.totalorder %s694_s16, 1 }
  0x14   : > { %s1284_s21 = scalar_select %p1032_p8, 1, 0 }
  0x15   : > { %s1285_s22 = scalar_select %p1036_p9, 1, 0 }
  0x16   : > { %s1041_s23 = scalar_select %p40_p7, %s945_s11, %s42_s18  }
  0x17   : > { %p1043_p11 = por %p113_p10, %p55_p3  ;;  %p753_p13 = scmp.lt.s32.totalorder %s957_s14, 2 }
  0x18   : > { %s1050_s25 = sand.u32 1, %s945_s11   ;;  %s714_s27 = smul.u32 768, %s953_s13 }
  0x19   : > { %s1286_s24 = scalar_select %p1043_p11, 1, 0 }
  0x1a   : > { %s713_s26 = smul.u32 48, %s1050_s25  ;;  %p1056_p0 = pnand %p753_p13, %p1026_p4 }
  0x1b   : > { %s1288_s0 = sld [smem:[#allocation13_spill]]  ;;  %s134_s6 = scalar_lea.sflag [#allocation4], %s1050_s25 }
  0x1c   : > { %s137_s4 = scalar_lea.vmem [#allocation3], %s713_s26  ;;  %p813_p3 = pneg %p1056_p0 }
  0x1d   : > { %s146_s5 = sshll.u32 %s137_s4, 4  ;;  %s1069_s5 = int_to_ptr.vmem [resolvable:$true] %s146_s5 }
  0x21   : > { %s1065_s3 = scalar_lea.hbm %s1288_s0, %s714_s27  ;;  %s816_s16 = scalar_lea.hbm %s1288_s0, 1536 }
  0x22   : > { %s811_s7 = scalar_lea.hbm %s1065_s3, 768  ;;  %p817_p6 = scmp.lt.u32.totalorder %s1065_s3, %s1288_s0 }
  0x23   : > { %p812_p2 = scmp.ne.s32.totalorder %s1065_s3, %s811_s7  ;;  %p818_p7 = scmp.lt.u32.totalorder %s816_s16, %s811_s7 }
  0x24   : > { %p820_p13 = scmp.lt.u32.totalorder %s811_s7, %s1065_s3 }
  0x25   : > { %p814_p4 = pnand %p813_p3, %p812_p2  ;;  %p819_p10 = por %p818_p7, %p817_p6 }
  0x27   : > { %p815_p5 = pneg %p814_p4  ;;  %p821_p12 = por %p820_p13, %p819_p10 }
  0x29   : > { %p822_p1 = pnand %p821_p12, %p815_p5 }
  0x2b   : > { %825 = shalt.err (!%p822_p1)
}
  0x2c   : > { %s826_s20 = scalar_lea.vmem %s1069_s5, 768  ;;  %s959_s29 = smov [#allocation3]  }
  0x2d   : > { %p827_p2 = scmp.ne.s32.totalorder %s1069_s5, %s826_s20  ;;  %s831_s30 = sshll.u32 %s959_s29, 4  ;;  %s832_s30 = int_to_ptr.vmem [resolvable:$false] %s831_s30 }
  0x2e   : > { %s833_s4 = scalar_lea.vmem %s832_s30, 1536  ;;  %p834_p9 = scmp.lt.s32.totalorder %s1069_s5, %s832_s30 }
  0x2f   : > { %p829_p4 = pnand %p827_p2, %p813_p3  ;;  %p835_p6 = scmp.lt.s32.totalorder %s833_s4, %s826_s20 }
  0x31   : > { %p830_p11 = pneg %p829_p4  ;;  %p836_p7 = por %p835_p6, %p834_p9 }
  0x33   : > { %p837_p10 = pnand %p836_p7, %p830_p11 }
  0x35   : > { %840 = shalt.err (!%p837_p10)
}
  0x36   : > { %s960_s7 = smov 128   ;;  %s961_s8 = smov 8  }
  0x37   : > { %745 = dma.hbm_to_vmem [thread:$0]  (!%p1056_p0), %s1065_s3, 768, %s1069_s5, %s134_s6, %s960_s7, %s960_s7, %s961_s8  }
  0x38   : > { %p177_p9 = scmp.lt.s32.totalorder %s957_s14, 3  ;;  %s1289_s1 = sld [smem:[#allocation14_spill]] }
  0x39   : > { %p1290_p11 = scmp.ge.s32.totalorder %s957_s14, 1  ;;  %s160_s20 = scalar_lea.vmem [#allocation6], %s713_s26 }
  0x3a   : > { %s169_s29 = sshll.u32 %s160_s20, 4  ;;  %s157_s3 = scalar_lea.sflag [#allocation7], %s1050_s25  ;;  %s1119_s29 = int_to_ptr.vmem [resolvable:$true] %s169_s29 }
  0x3b   : > { %p1113_p12 = pnand %p1290_p11, %p177_p9 }
  0x3e   : > { %s1109_s18 = scalar_lea.hbm %s1289_s1, %s714_s27  ;;  %s846_s30 = scalar_lea.hbm %s1289_s1, 1536 }
  0x3f   : > { %s841_s5 = scalar_lea.hbm %s1109_s18, 768  ;;  %p847_p2 = scmp.lt.u32.totalorder %s1109_s18, %s1289_s1 }
  0x40   : > { %p842_p1 = scmp.ne.s32.totalorder %s1109_s18, %s841_s5  ;;  %p848_p4 = scmp.lt.u32.totalorder %s846_s30, %s841_s5 }
  0x41   : > { %p850_p7 = scmp.lt.u32.totalorder %s841_s5, %s1109_s18 }
  0x42   : > { %p844_p5 = pnand %p842_p1, %p813_p3  ;;  %p849_p6 = por %p848_p4, %p847_p2 }
  0x44   : > { %p845_p13 = pneg %p844_p5  ;;  %p851_p10 = por %p850_p7, %p849_p6 }
  0x46   : > { %p852_p9 = pnand %p851_p10, %p845_p13 }
  0x48   : > { %855 = shalt.err (!%p852_p9)
}
  0x49   : > { %s856_s26 = scalar_lea.vmem %s1119_s29, 768  ;;  %s962_s16 = smov [#allocation6]  }
  0x4a   : > { %p857_p11 = scmp.ne.s32.totalorder %s1119_s29, %s856_s26  ;;  %s861_s20 = sshll.u32 %s962_s16, 4  ;;  %s862_s20 = int_to_ptr.vmem [resolvable:$false] %s861_s20 }
  0x4b   : > { %s863_s27 = scalar_lea.vmem %s862_s20, 1536  ;;  %p864_p8 = scmp.lt.s32.totalorder %s1119_s29, %s862_s20 }
  0x4c   : > { %p859_p1 = pnand %p857_p11, %p813_p3  ;;  %p865_p2 = scmp.lt.s32.totalorder %s863_s27, %s856_s26 }
  0x4e   : > { %p860_p5 = pneg %p859_p1  ;;  %p866_p4 = por %p865_p2, %p864_p8 }
  0x50   : > { %p867_p6 = pnand %p866_p4, %p860_p5 }
  0x52   : > { %870 = shalt.err (!%p867_p6)
}
  0x53   : > { %748 = dma.hbm_to_vmem [thread:$0]  (!%p1056_p0), %s1109_s18, 768, %s1119_s29, %s157_s3, %s960_s7, %s960_s7, %s961_s8  }
  0x54   : > { %181 = sbr.rel (%p1113_p12) target bundleno = 651 (0x28b), region = 28  ;;  %s1153_s5 = sand.u32 (!%p1113_p12), 1, %s941_s10  }
  0x55   : > { %s717_s6 = smul.u32 (!%p1113_p12), 48, %s1153_s5  ;;  %s184_s30 = scalar_lea.sflag (!%p1113_p12), [#allocation4], %s1153_s5 }
  0x56   : > { %p1292_p8 = scmp.ne.s32.totalorder (!%p1113_p12), %s1284_s21, 0 }
  0x57   : > { %s187_s28 = scalar_lea.vmem (!%p1113_p12), [#allocation3], %s717_s6 }
  0x5b   : > { %924 = dma.done.wait (%p1292_p8), %s184_s30, 768  }
  0x5c   : > { %926 = vsyncadd (%p1292_p8), %s184_s30, 4294966528  ;;  %s193_s25 = scalar_lea.sflag [#allocation7], %s1153_s5  ;;  %s196_s7 = scalar_lea.vmem [#allocation6], %s717_s6 }
  0x5d   : > { %928 = dma.done.wait (%p1292_p8), %s193_s25, 768  }
  0x5e   : > { %930 = vsyncadd (%p1292_p8), %s193_s25, 4294966528  ;;  %vm229_vm0 = vcmask 123904   ;;  %v963_v0 = vmov 0.0   ;;  %v231_v1 = vld [vmem:[%s187_s28] sm:$0xff]  ;;  %v232_v2 = vld [vmem:[%s187_s28 + $0x8] sm:$0xff]  ;;  %vm566_vm1 = vcmask 130054  }
  0x5f   : > { %230 = vst.msk [vmem:[#allocation2] sm:$0x3] %vm229_vm0, %v963_v0  ;;  %v233_v3 = vld [vmem:[%s196_s7] sm:$0xff]  ;;  %v234_v4 = vld [vmem:[%s196_s7 + $0x8] sm:$0xff]  ;;  %v701_v6 = vld [vmem:[%s187_s28 + $0x10] sm:$0xff]  ;;  %vm275_vm2 = vcmask 1041408  }
  0x60   : > { %v235_v5 = vsub.f32 %v231_v1, %v233_v3  ;;  %v702_v7 = vld [vmem:[%s187_s28 + $0x18] sm:$0xff]  ;;  %v236_v8 = vsub.f32 %v232_v2, %v234_v4  ;;  %v703_v9 = vld [vmem:[%s196_s7 + $0x10] sm:$0xff]  ;;  %v705_v11 = vld [vmem:[%s187_s28 + $0x20] sm:$0xff]  ;;  %vm267_vm3 = vcmask 1046528   ;;  %s964_s21 = smov 2   ;;  %vm285_vm4 = vcmask 1040384  }
  0x61   : > { %v704_v10 = vld [vmem:[%s196_s7 + $0x18] sm:$0xff]  ;;  %v245_v13 = vsub.f32 %v701_v6, %v703_v9  ;;  %v706_v15 = vld [vmem:[%s187_s28 + $0x28] sm:$0xff]  ;;  %v707_v16 = vld [vmem:[%s196_s7 + $0x20] sm:$0xff]  ;;  %s965_s8 = smov 1   ;;  %vm314_vm5 = vcmask 1045504   ;;  %s966_s18 = smov 127  }
  0x62   : > { %v237_v12 = vmul.f32 0.2989, %v235_v5  ;;  %v246_v14 = vsub.f32 %v702_v7, %v704_v10  ;;  %v708_v17 = vld [vmem:[%s196_s7 + $0x28] sm:$0xff]  ;;  %v238_v18 = vmul.f32 0.2989, %v236_v8  ;;  %v257_v19 = vsub.f32 %v705_v11, %v707_v16  ;;  %s967_s19 = smov 114  }
  0x63   : > { %v258_v20 = vsub.f32 %v706_v15, %v708_v17  ;;  %v247_v21 = vmul.f32 0.587, %v245_v13  ;;  %s968_s29 = smov 126   ;;  %vm368_vm6 = vcmask 7168   ;;  %vm435_vm7 = vcmask 106496   ;;  %s700_s25 = sshll.u32 %s1153_s5, 3 }
  0x64   : > { %v248_v22 = vmul.f32 0.587, %v246_v14  ;;  %v259_v23 = vmul.f32 0.114, %v257_v19  ;;  %vm370_vm8 = vcmask 5120   ;;  %vm343_vm9 = vcmask 113664  }
  0x65   : > { %v260_v24 = vmul.f32 0.114, %v258_v20  ;;  %v249_v25 = vadd.f32 %v247_v21, %v237_v12  ;;  %vm345_vm10 = vcmask 111616   ;;  %s710_s0 = sshll.u32 %s949_s12, 7  ;;  %s221_s17 = scalar_lea.vmem [#allocation8], %s700_s25 }
  0x66   : > { %v250_v26 = vadd.f32 %v248_v22, %v238_v18  ;;  %v264_v27 = vld [vmem:[#allocation2 + $0x1] sm:$0x1]  ;;  %p1293_p3 = scmp.ne.s32.totalorder %s1285_s22, 0  ;;  %s969_s12 = smov [#allocation8]  }
  0x67   : > { %v261_v28 = vadd.f32 %v259_v23, %v249_v25  ;;  %v408_v46 = vrot.slane %v264_v27, 7 }
  0x68   : > { %v1166_v29 = vadd.f32 %v260_v24, %v250_v26 }
  0x69   : > { %v1168_v30 = vadd.f32 %v264_v27, %v261_v28  ;;  %v276_v31 = vrot.slane %v261_v28, 6  ;;  %v268_v33 = vrot.slane %v261_v28, 1  ;;  %v410_v51 = vsub.f32 %v261_v28, %v408_v46 }
  0x6a   : > { %567 = vst.msk [vmem:[#allocation2 - $0x6] sm:$0xc0] %vm566_vm1, %v1166_v29  ;;  %v277_v32 = vrot.slane %v1166_v29, 6  ;;  %v269_v34 = vrot.slane %v1166_v29, 1  ;;  %v514_v53 = vsub.f32 0.0, %v1166_v29 }
  0x6b   : > { %412 = vrot.lane.b32.xlu0 %v1168_v30, %s964_s21  ;;  %v1175_v36 = vadd.f32 %v268_v33, %v261_v28  ;;  %v281_v41 = vsub.f32 %v261_v28, %v276_v31  ;;  %v417_v54 = vrot.slane %v410_v51, 1 }
  0x6c   : > { %v278_v35 = vsel %vm275_vm2, %v276_v31, %v277_v32  ;;  %v270_v38 = vsel %vm267_vm3, %v268_v33, %v269_v34  ;;  %v1180_v39 = vadd.f32 %v269_v34, %v1166_v29  ;;  %v520_v55 = vrot.slane %v514_v53, 7 }
  0x6d   : > { %v282_v37 = vsub.f32 %v1166_v29, %v278_v35  ;;  %v273_v40 = vadd.f32 %v270_v38, %v261_v28  ;;  %v299_v47 = vrot.slane %v281_v41, 1  ;;  %v315_v49 = vrot.slane %v281_v41, 2 }
  0x6e   : > { %v287_v43 = vrot.slane %v1180_v39, 7  ;;  %v313_v59 = vsub.f32 0.0, %v1180_v39 }
  0x6f   : > { %v300_v42 = vrot.slane %v282_v37, 1  ;;  %v286_v44 = vrot.slane %v273_v40, 7  ;;  %v316_v45 = vrot.slane %v282_v37, 2  ;;  %v312_v1 = vsub.f32 0.0, %v273_v40 }
  0x71   : > { %304 = vrot.lane.b32.xlu1 %v300_v42, %s965_s8  ;;  %289 = vrot.lane.b32.xlu0 %v286_v44, %s964_s21  ;;  %v288_v48 = vsel %vm285_vm4, %v286_v44, %v287_v43  ;;  %v301_v50 = vsel %vm267_vm3, %v299_v47, %v300_v42  ;;  %v317_v52 = vsel %vm314_vm5, %v315_v49, %v316_v45 }
  0x75   : > { %320 = vrot.lane.b32.xlu1 %v316_v45, %s966_s18  ;;  %291 = vrot.lane.b32.xlu0 %v288_v48, %s964_s21 }
  0x79   : > { %302 = vrot.lane.b32.xlu1 %v301_v50, %s965_s8  ;;  %318 = vrot.lane.b32.xlu0 %v317_v52, %s966_s18 }
  0x7d   : > { %515 = vrot.lane.b32.xlu1 %v287_v43, %s964_s21  ;;  %418 = vrot.lane.b32.xlu0 %v417_v54, %s965_s8 }
  0x81   : > { %521 = vrot.lane.b32.xlu1 %v520_v55, %s965_s8 }
  0xdd   : > { %v413_v56 = vpop.permute.xlu0 %412 }
  0xde   : > { %v415_v25 = vsub.f32 %v1175_v36, %v413_v56 }
  0xe3   : > { %v305_v57 = vpop.permute.xlu1 %304  ;;  %v290_v58 = vpop.permute.xlu0 %289 }
  0xe4   : > { %v311_v60 = vadd.f32 %v305_v57, %v1180_v39  ;;  %v295_v3 = vsub.f32 %v273_v40, %v290_v58 }
  0xe6   : > { %v329_v2 = vand.u32 2147483647, %v311_v60 }
  0xe7   : > { %v321_v61 = vpop.permute.xlu1 %320  ;;  %v292_v63 = vpop.permute.xlu0 %291 }
  0xe8   : > { %v325_v62 = vadd.f32 %v321_v61, %v313_v59  ;;  %v296_v0 = vsub.f32 %v1180_v39, %v292_v63  ;;  %v360_v11 = vrot.slane %v329_v2, 1 }
  0xea   : > { %v331_v4 = vand.u32 2147483647, %v325_v62  ;;  %v309_v5 = vadd.f32 %v305_v57, %v296_v0 }
  0xeb   : > { %v303_v6 = vpop.permute.xlu1 %302  ;;  %v319_v9 = vpop.permute.xlu0 %318 }
  0xec   : > { %v308_v7 = vadd.f32 %v303_v6, %v295_v3  ;;  %v310_v8 = vadd.f32 %v303_v6, %v273_v40  ;;  %387 = vrot.lane.b32.xlu1 %v331_v4, %s967_s19  ;;  %v324_v10 = vadd.f32 %v319_v9, %v312_v1  ;;  %v327_v12 = vand.u32 2147483647, %v309_v5 }
  0xee   : > { %v328_v13 = vand.u32 2147483647, %v310_v8  ;;  %v330_v14 = vand.u32 2147483647, %v324_v10  ;;  %v326_v16 = vand.u32 2147483647, %v308_v7 }
  0xef   : > { %v516_v15 = vpop.permute.xlu1 %515  ;;  %v335_v19 = vrot.slane %v327_v12, 1  ;;  %v419_v23 = vpop.permute.xlu0 %418 }
  0xf0   : > { %v359_v17 = vrot.slane %v328_v13, 1  ;;  %364 = vrot.lane.b32.xlu1 %v360_v11, %s966_s18  ;;  %v518_v18 = vsub.f32 %v1166_v29, %v516_v15  ;;  %385 = vrot.lane.b32.xlu0 %v330_v14, %s967_s19  ;;  %v334_v22 = vrot.slane %v326_v16, 1  ;;  %v421_v27 = vadd.f32 %v419_v23, %v415_v25 }
  0xf1   : > { %v422_v33 = vadd.f32 %v419_v23, %v1175_v36  ;;  %v423_v36 = vsub.f32 0.0, %v1168_v30 }
  0xf2   : > { %v361_v20 = vsel %vm267_vm3, %v359_v17, %v360_v11  ;;  %v336_v28 = vsel %vm267_vm3, %v334_v22, %v335_v19  ;;  %v428_v32 = vand.u32 2147483647, %v421_v27 }
  0xf3   : > { %v522_v21 = vpop.permute.xlu1 %521  ;;  %v429_v34 = vand.u32 2147483647, %v422_v33 }
  0xf4   : > { %339 = vrot.lane.b32.xlu1 %v335_v19, %s968_s29  ;;  %v524_v24 = vadd.f32 %v522_v21, %v518_v18  ;;  %362 = vrot.lane.b32.xlu0 %v361_v20, %s966_s18  ;;  %v525_v63 = vadd.f32 %v522_v21, %v1166_v29 }
  0xf6   : > { %v530_v26 = vand.u32 2147483647, %v524_v24  ;;  %v531_v0 = vand.u32 2147483647, %v525_v63 }
  0xf8   : > { %v534_v31 = vrot.slane %v530_v26, 7  ;;  %337 = vrot.lane.b32.xlu0 %v336_v28, %s968_s29  ;;  %v550_v1 = vrot.slane %v531_v0, 7 }
  0xfa   : > { %535 = vrot.lane.b32.xlu1 %v534_v31, %s968_s29 }
  0xfc   : > { %432 = vrot.lane.b32.xlu0 %v428_v32, %s968_s29 }
  0xfe   : > { %526 = vrot.lane.b32.xlu1 %v514_v53, %s966_s18 }
 0x100   : > { %424 = vrot.lane.b32.xlu0 %v417_v54, %s966_s18 }
 0x104   : > { %448 = vrot.lane.b32.xlu0 %v429_v34, %s966_s18 }
 0x15e   : > { %v388_v37 = vpop.permute.xlu1 %387 }
 0x15f   : > { %v392_v45 = vsel %vm370_vm8, %v388_v37, 0.0 }
 0x162   : > { %v386_v35 = vpop.permute.xlu0 %385  ;;  %v365_v41 = vpop.permute.xlu1 %364 }
 0x163   : > { %v391_v43 = vsel %vm368_vm6, %v386_v35, 0.0  ;;  %v371_v61 = vsel %vm370_vm8, %v365_v41, 0.0 }
 0x164   : > { %v393_v48 = vadd.f32 %v392_v45, %v391_v43 }
 0x166   : > { %v363_v38 = vpop.permute.xlu0 %362  ;;  %v340_v46 = vpop.permute.xlu1 %339 }
 0x167   : > { %v346_v51 = vsel %vm345_vm10, %v340_v46, 0.0  ;;  %v369_v58 = vsel %vm368_vm6, %v363_v38, 0.0 }
 0x168   : > { %v372_v62 = vadd.f32 %v371_v61, %v369_v58 }
 0x16a   : > { %v338_v40 = vpop.permute.xlu0 %337 }
 0x16b   : > { %v344_v49 = vsel %vm343_vm9, %v338_v40, 0.0 }
 0x16c   : > { %v347_v53 = vadd.f32 %v346_v51, %v344_v49  ;;  %v536_v54 = vpop.permute.xlu1 %535 }
 0x16d   : > { %v538_v60 = vsel %vm435_vm7, %v536_v54, 0.0 }
 0x16e   : > { %v433_v42 = vpop.permute.xlu0 %432 }
 0x16f   : > { %v436_v44 = vsel %vm435_vm7, %v433_v42, 0.0 }
 0x170   : > { %437 = vadd.xlane.f32.xlu0 %v436_v44  ;;  %v527_v55 = vpop.permute.xlu1 %526 }
 0x171   : > { %v529_v30 = vadd.f32 %v527_v55, %v313_v59 }
 0x172   : > { %v425_v47 = vpop.permute.xlu0 %424 }
 0x173   : > { %v427_v50 = vadd.f32 %v425_v47, %v423_v36  ;;  %v532_v56 = vand.u32 2147483647, %v529_v30 }
 0x174   : > { %394 = vadd.xlane.f32.xlu0 %v393_v48 }
 0x175   : > { %v430_v52 = vand.u32 2147483647, %v427_v50  ;;  %v558_v57 = vrot.slane %v532_v56, 6 }
 0x176   : > { %v449_v39 = vpop.permute.xlu0 %448 }
 0x177   : > { %455 = vrot.lane.b32.xlu1 %v430_v52, %s967_s19 }
 0x178   : > { %348 = vadd.xlane.f32.xlu0 %v347_v53 }
 0x18e   : > { %559 = vrot.lane.b32.xlu0 %v558_v57, %s967_s19 }
 0x19b   : > { %539 = vadd.xlane.f32.xlu1 %v538_v60 }
 0x19f   : > { %373 = vadd.xlane.f32.xlu1 %v372_v62 }
 0x1b0   : > { %551 = vrot.lane.b32.xlu1 %v550_v1, %s966_s18 }
 0x1e9   : > { %v456_v10 = vpop.permute.xlu1 %455 }
 0x1fd   : > { %v438_v59 = vpop.xlane.xlu0 %437 }
 0x1fe   : > { %v439_v12 = vrot.slane %v438_v59, 4 }
 0x200   : > { %v440_v14 = vadd.f32 %v439_v12, %v438_v59 }
 0x201   : > { %v395_v2 = vpop.xlane.xlu0 %394 }
 0x202   : > { %v396_v11 = vrot.slane %v395_v2, 4  ;;  %v441_v19 = vrot.slane %v440_v14, 2 }
 0x204   : > { %v397_v13 = vadd.f32 %v396_v11, %v395_v2  ;;  %v442_v25 = vadd.f32 %v441_v19, %v440_v14 }
 0x205   : > { %v349_v3 = vpop.xlane.xlu0 %348 }
 0x206   : > { %v350_v4 = vrot.slane %v349_v3, 4  ;;  %v398_v16 = vrot.slane %v397_v13, 2  ;;  %v443_v32 = vrot.slane %v442_v25, 1 }
 0x208   : > { %v351_v5 = vadd.f32 %v350_v4, %v349_v3  ;;  %v399_v23 = vadd.f32 %v398_v16, %v397_v13  ;;  %v444_v37 = vadd.f32 %v443_v32, %v442_v25 }
 0x209   : > { %v560_v40 = vpop.permute.xlu0 %559 }
 0x20a   : > { %v352_v6 = vrot.slane %v351_v5, 2  ;;  %v400_v27 = vrot.slane %v399_v23, 1 }
 0x20c   : > { %v353_v7 = vadd.f32 %v352_v6, %v351_v5  ;;  %v401_v34 = vadd.f32 %v400_v27, %v399_v23 }
 0x20e   : > { %v354_v8 = vrot.slane %v353_v7, 1 }
 0x210   : > { %v355_v9 = vadd.f32 %v354_v8, %v353_v7 }
 0x212   : > { %718 = vpush %v355_v9 }
 0x228   : > { %v540_v29 = vpop.xlane.xlu1 %539 }
 0x229   : > { %v541_v15 = vrot.slane %v540_v29, 4 }
 0x22b   : > { %v542_v17 = vadd.f32 %v541_v15, %v540_v29 }
 0x22c   : > { %v374_v18 = vpop.xlane.xlu1 %373 }
 0x22d   : > { %v375_v20 = vrot.slane %v374_v18, 4  ;;  %v543_v22 = vrot.slane %v542_v17, 2 }
 0x22f   : > { %v376_v21 = vadd.f32 %v375_v20, %v374_v18  ;;  %v544_v28 = vadd.f32 %v543_v22, %v542_v17 }
 0x230   : > { %v552_v41 = vpop.permute.xlu1 %551 }
 0x231   : > { %v377_v24 = vrot.slane %v376_v21, 2  ;;  %v545_v35 = vrot.slane %v544_v28, 1 }
 0x233   : > { %v378_v26 = vadd.f32 %v377_v24, %v376_v21  ;;  %v546_v38 = vadd.f32 %v545_v35, %v544_v28 }
 0x235   : > { %v379_v31 = vrot.slane %v378_v26, 1 }
 0x237   : > { %v380_v33 = vadd.f32 %v379_v31, %v378_v26 }
 0x239   : > { %720 = vpush %v380_v33 }
 0x23a   : > { %722 = vpush %v401_v34 }
 0x23b   : > { %724 = vpush %v444_v37 }
 0x23c   : > { %726 = vpush %v449_v39 }
 0x23d   : > { %728 = vpush %v456_v10 }
 0x23e   : > { %730 = vpush %v546_v38 }
 0x23f   : > { %732 = vpush %v552_v41 }
 0x240   : > { %734 = vpush %v560_v40 }
 0x243   : > { %s719_s3 = spop %718 }
 0x26a   : > { %s721_s4 = spop %720 }
 0x26b   : > { %s382_s15 = sadd.f32 %s721_s4, %s719_s3  ;;  %s723_s26 = spop %722 }
 0x26c   : > { %s725_s16 = spop %724  ;;  %s586_s3 = sshll.u32 %s221_s17, 4  ;;  %s1227_s3 = int_to_ptr.vmem [resolvable:$true] %s586_s3 }
 0x26d   : > { %s403_s20 = sadd.f32 %s723_s26, %s382_s15  ;;  %s727_s27 = spop %726 }
 0x26e   : > { %s452_s6 = sadd.f32 %s727_s27, %s725_s16  ;;  %s729_s30 = spop %728 }
 0x26f   : > { %s731_s28 = spop %730  ;;  %s1225_s26 = scalar_lea.hbm %s1276_s2, %s710_s0 }
 0x270   : > { %s459_s7 = sadd.f32 %s729_s30, %s452_s6  ;;  %s733_s21 = spop %732 }
 0x271   : > { %s555_s8 = sadd.f32 %s733_s21, %s731_s28  ;;  %s735_s18 = spop %734 }
 0x272   : > { %s460_s19 = sadd.f32 %s459_s7, %s403_s20  ;;  %s573_s16 = scalar_lea.sflag [#allocation5], %s1153_s5 }
 0x273   : > { %s563_s29 = sadd.f32 %s735_s18, %s555_s8  ;;  %s871_s27 = scalar_lea.vmem %s1227_s3, 128 }
 0x274   : > { %p872_p0 = scmp.ne.s32.totalorder %s1227_s3, %s871_s27  ;;  %s875_s20 = sshll.u32 %s969_s12, 4  ;;  %s876_s20 = int_to_ptr.vmem [resolvable:$false] %s875_s20 }
 0x275   : > { %s565_s1 = sadd.f32 %s563_s29, %s460_s19  ;;  %p878_p7 = scmp.lt.s32.totalorder %s1227_s3, %s876_s20 }
 0x276   : > { %p873_p12 = pnand %p872_p0, %p1293_p3 }
 0x277   : > { %v569_v42 = vstv %s565_s1  ;;  %s877_s1 = scalar_lea.vmem %s876_s20, 256 }
 0x278   : > { %571 = vst [vmem:[%s221_s17] sm:$0xff] %v569_v42  ;;  %p874_p13 = pneg %p873_p12  ;;  %p879_p10 = scmp.lt.s32.totalorder %s877_s1, %s871_s27 }
 0x27a   : > { %p880_p9 = por %p879_p10, %p878_p7 }
 0x27c   : > { %p881_p11 = pnand %p880_p9, %p874_p13 }
 0x27e   : > { %884 = shalt.err (!%p881_p11)
}
 0x27f   : > { %s885_s0 = scalar_lea.hbm %s1225_s26, 128  ;;  %s889_s6 = scalar_lea.hbm %s1276_s2, 256 }
 0x280   : > { %p886_p1 = scmp.ne.s32.totalorder %s1225_s26, %s885_s0  ;;  %p890_p4 = scmp.lt.u32.totalorder %s1225_s26, %s1276_s2 }
 0x281   : > { %p891_p6 = scmp.lt.u32.totalorder %s889_s6, %s885_s0  ;;  %p893_p0 = scmp.lt.u32.totalorder %s885_s0, %s1225_s26 }
 0x282   : > { %p887_p5 = pnand %p886_p1, %p1293_p3 }
 0x283   : > { %p892_p8 = por %p891_p6, %p890_p4 }
 0x284   : > { %p888_p2 = pneg %p887_p5 }
 0x285   : > { %p894_p12 = por %p893_p0, %p892_p8 }
 0x287   : > { %p895_p13 = pnand %p894_p12, %p888_p2 }
 0x289   : > { %898 = shalt.err (!%p895_p13)
}
 0x28a   : > { %740 = dma.vmem_to_hbm [thread:$0]  (%p1293_p3), %s1227_s3, 128, %s1225_s26, %s573_s16  }
 0x28b PF: > { %s598_s25 = sand.u32 1, %s937_s9   ;;  %p1294_p7 = scmp.ne.s32.totalorder %s1286_s24, 0 }
 0x28c   : > { %p1295_p10 = scmp.ge.s32.totalorder %s957_s14, 2  ;;  %s599_s7 = scalar_lea.sflag [#allocation5], %s598_s25 }
 0x28e   : > { %p750_p9 = pnand %p1295_p10, %p1294_p7 }
 0x290   : > { %932 = dma.done.wait (!%p750_p9), %s599_s7, 128  }
 0x291   : > { %934 = vsyncadd (!%p750_p9), %s599_s7, 4294967168  ;;  %s21_s14 = sadd.s32 1, %s957_s14   ;;  %s1296_s22 = sld [smem:[#allocation12_spill]] }
 0x292   : > { %p18_p11 = scmp.ge.s32.totalorder %s21_s14, 4   ;;  %s1297_s9 = smov %s941_s10 }
 0x293   : > { %s1298_s10 = smov %s945_s11  ;;  %s1299_s11 = smov %s1041_s23 }
 0x294   : > { %s1300_s12 = smov %s953_s13  ;;  %20 = sbr.rel (!%p18_p11) target bundleno = 11 (0xb), region = 94 }
 0x297   : > { %s1301_s13 = smov %s1296_s22 }
 0x29b   :  { %604 = vsyncpa [#allocation4], 1 }
 0x29c   :  { %606 = vsyncpa [#allocation4 + $0x1], 1 }
 0x29d   :  { %607 = vsyncpa [#allocation7], 1 }
 0x29e   :  { %609 = vsyncpa [#allocation7 + $0x1], 1 }
 0x29f   :  { %610 = vsyncpa [#allocation5], 1 }
 0x2a0   :  { %612 = vsyncpa [#allocation5 + $0x1], 1 }

</bundles_post_ra>
